<compile_context>
chip_gen: v6e
topology: v6e:2x2x1
jax: 0.10.0
libtpu: 0.0.40
codegen_flags: <defaults>
</compile_context>

<pallas_src>
import functools

import jax
import jax.numpy as jnp
from jax.experimental import pallas as pl
from jax.experimental.pallas import tpu as pltpu

LANE = 128
BLOCK_BYTES_PER_INPUT = 4 << 20   # ~4 MiB of native-dtype data per input per buffer
VMEM_LIMIT_BYTES = 48 << 20       # > v5e 16 MiB scoped default, < v7x 64 MiB physical


def _sublane_multiple(dtype):
    # f32 -> 8, bf16/f16 -> 16, 8-bit -> 32 (packed sublane tiling constraint)
    return max(8, 32 // jnp.dtype(dtype).itemsize)


def _hdr_partial_kernel(d_ref, t_ref, out_ref, *, eps, block_rows, valid_rows_last):
    """Partial sum of (d - t)^2 / (d + eps)^2 over one block, folded to (8, LANE)."""
    d = d_ref[...].astype(jnp.float32)
    t = t_ref[...].astype(jnp.float32)

    diff = d - t
    # Exact divide keeps parity with the reference mean.  (If profiling shows
    # the VALU slot saturated — e.g. bf16 inputs on v7x — switch to
    # diff * pl.reciprocal(d + eps, approx=True) to move the work to the EUP
    # slot at the cost of a small bias.)
    r = diff / (d + eps)           # (diff/den)^2 == diff^2/den^2, one fewer multiply
    val = r * r

    def fold(x):
        # (block_rows, LANE) -> (8, LANE) partial via sublane-tile-aligned
        # reshape + reduce over the leading axis (no VMEM relayout).
        return x.reshape(block_rows // 8, 8, LANE).sum(axis=0)

    if valid_rows_last < block_rows:
        # Only the last grid step extends past the real data; its OOB rows hold
        # undefined values, so select them away after the compute.
        i = pl.program_id(0)
        last = pl.num_programs(0) - 1

        @pl.when(i != last)
        def _():
            out_ref[...] = fold(val)

        @pl.when(i == last)
        def _():
            row_ids = jax.lax.broadcasted_iota(jnp.int32, (block_rows, LANE), 0)
            out_ref[...] = fold(jnp.where(row_ids < valid_rows_last, val, 0.0))
    else:
        out_ref[...] = fold(val)


def hdr_loss(denoised, target, eps=0.01):
    """Pallas implementation of HDRLoss.forward. Returns a scalar f32."""
    assert denoised.shape == target.shape
    eps = float(eps)
    n_elems = denoised.size

    d_flat = denoised.reshape(-1)
    t_flat = target.reshape(-1)

    rem = n_elems % LANE
    n_main = n_elems - rem
    rows = n_main // LANE

    total = jnp.zeros((), jnp.float32)

    if rem:
        # <=127 trailing elements: finish them with plain jnp instead of
        # materializing padded copies of both inputs in HBM.
        dr = d_flat[n_main:].astype(jnp.float32)
        tr = t_flat[n_main:].astype(jnp.float32)
        dd = dr - tr
        den = dr + eps
        total = total + jnp.sum(dd * dd / (den * den))

    if rows:
        d2 = d_flat[:n_main].reshape(rows, LANE)
        t2 = t_flat[:n_main].reshape(rows, LANE)

        sub = max(_sublane_multiple(d2.dtype), _sublane_multiple(t2.dtype))
        itemsize = max(jnp.dtype(d2.dtype).itemsize, jnp.dtype(t2.dtype).itemsize)
        # Byte-budgeted block: ~4 MiB of the widest input dtype, rounded to the
        # sublane multiple; clamp to the (sublane-rounded) data extent.
        budget_rows = max(sub, (BLOCK_BYTES_PER_INPUT // (LANE * itemsize)) // sub * sub)
        block_rows = min(budget_rows, pl.cdiv(rows, sub) * sub)
        n_blocks = pl.cdiv(rows, block_rows)
        valid_rows_last = rows - (n_blocks - 1) * block_rows

        kernel = functools.partial(
            _hdr_partial_kernel,
            eps=eps,
            block_rows=block_rows,
            valid_rows_last=valid_rows_last,
        )

        n_kern = rows * LANE
        cost = pl.CostEstimate(
            flops=6 * n_kern,
            transcendentals=n_kern,
            bytes_accessed=(rows * LANE * (jnp.dtype(d2.dtype).itemsize
                                           + jnp.dtype(t2.dtype).itemsize)
                            + n_blocks * 8 * LANE * 4),
        )

        partials = pl.pallas_call(
            kernel,
            out_shape=jax.ShapeDtypeStruct((n_blocks * 8, LANE), jnp.float32),
            grid_spec=pltpu.PrefetchScalarGridSpec(
                num_scalar_prefetch=0,
                grid=(n_blocks,),
                in_specs=[
                    pl.BlockSpec((block_rows, LANE), lambda i: (i, 0)),
                    pl.BlockSpec((block_rows, LANE), lambda i: (i, 0)),
                ],
                out_specs=pl.BlockSpec((8, LANE), lambda i: (i, 0)),
            ),
            compiler_params=pltpu.CompilerParams(
                # Independent per-block partials: fully parallel grid axis.
                # On v7x, verify in a trace that both TensorCores are active;
                # if not, switch to pltpu.CORE_PARALLEL / pl.core_map.
                dimension_semantics=("parallel",),
                vmem_limit_bytes=VMEM_LIMIT_BYTES,
            ),
            cost_estimate=cost,
        )(d2, t2)
        total = total + jnp.sum(partials)

    return total / jnp.float32(n_elems)


def _reference(denoised, target, eps=0.01):
    loss = (denoised - target) ** 2 / (denoised + eps) ** 2
    return jnp.mean(loss.reshape(-1))


if __name__ == "__main__":
    key = jax.random.PRNGKey(0)
    k1, k2 = jax.random.split(key)
    # NCHW, same convention as the PyTorch module's inputs.
    denoised = jax.random.uniform(k1, (2, 4, 16, 16), jnp.float32) + 0.1
    target = jax.random.uniform(k2, (2, 4, 16, 16), jnp.float32) + 0.1

    loss = jax.block_until_ready(hdr_loss(denoised, target))
    ref = jax.block_until_ready(_reference(denoised, target))

    assert jnp.allclose(loss, ref, rtol=1e-5, atol=1e-6), (loss, ref)
    print("KERNEL_OK")
</pallas_src>

<mosaic_0001>
module attributes {stable_mosaic.version = 11 : i64} {
  func.func @_hdr_partial_kernel(%arg0: i32, %arg1: memref<16x128xf32, #tpu.memory_space<vmem>>, %arg2: memref<16x128xf32, #tpu.memory_space<vmem>>, %arg3: memref<8x128xf32, #tpu.memory_space<vmem>>) attributes {dimension_semantics = [#tpu.dimension_semantics<parallel>], iteration_bounds = array<i64: 1>, scalar_prefetch = 0 : i64, scratch_operands = 0 : i64, tpu.core_type = #tpu.core_type<tc>, window_params = [{transform_indices = @transform_0, window_bounds = array<i64: 16, 128>}, {transform_indices = @transform_1, window_bounds = array<i64: 16, 128>}, {transform_indices = @transform_2, window_bounds = array<i64: 8, 128>}]} {
    %c0 = arith.constant 0 : index
    %c0_0 = arith.constant 0 : index
    %0 = vector.load %arg1[%c0, %c0_0] : memref<16x128xf32, #tpu.memory_space<vmem>>, vector<16x128xf32>
    %c0_1 = arith.constant 0 : index
    %c0_2 = arith.constant 0 : index
    %1 = vector.load %arg2[%c0_1, %c0_2] : memref<16x128xf32, #tpu.memory_space<vmem>>, vector<16x128xf32>
    %2 = arith.subf %0, %1 : vector<16x128xf32>
    %cst = arith.constant 0.00999999977 : f32
    %3 = vector.broadcast %cst : f32 to vector<16x128xf32>
    %4 = arith.addf %0, %3 : vector<16x128xf32>
    %5 = arith.divf %2, %4 : vector<16x128xf32>
    %6 = arith.mulf %5, %5 : vector<16x128xf32>
    %7 = vector.shape_cast %6 : vector<16x128xf32> to vector<2x8x128xf32>
    %cst_3 = arith.constant dense<0.000000e+00> : vector<8x128xf32>
    %8 = vector.multi_reduction <add>, %7, %cst_3 [0] : vector<2x8x128xf32> to vector<8x128xf32>
    %c0_4 = arith.constant 0 : index
    %c0_5 = arith.constant 0 : index
    %9 = vector.load %arg3[%c0_4, %c0_5] : memref<8x128xf32, #tpu.memory_space<vmem>>, vector<8x128xf32>
    tpu.vector_store %arg3[%c0_4, %c0_5], %8 {strides = array<i32>} : memref<8x128xf32, #tpu.memory_space<vmem>>, vector<8x128xf32>,
    return
  }
  func.func @transform_0(%arg0: i32) -> (i32, i32) {
    %c0_i32 = arith.constant 0 : i32
    %c0_i32_0 = arith.constant 0 : i32
    return %arg0, %c0_i32 : i32, i32
  }
  func.func @transform_1(%arg0: i32) -> (i32, i32) {
    %c0_i32 = arith.constant 0 : i32
    %c0_i32_0 = arith.constant 0 : i32
    return %arg0, %c0_i32 : i32, i32
  }
  func.func @transform_2(%arg0: i32) -> (i32, i32) {
    %c0_i32 = arith.constant 0 : i32
    %c0_i32_0 = arith.constant 0 : i32
    return %arg0, %c0_i32 : i32, i32
  }
}

</mosaic_0001>

<bundles_post_ra>
// kernel: tpu_custom_call.1
= control target key start
LH: loop header
LB: loop body
LE: loop exit
PB: predicated region body
PF: predicated region fallthrough
CT: control target
= control target key end

     0   :  { %7 = vsyncpa [#allocation3], 0  ;;  %s176_s0 = inlined_call_operand.hbm [shape: f32[16,128], index: 0, kind: input, shape index: {}]   ;;  %s177_s1 = inlined_call_operand.hbm [shape: f32[16,128], index: 1, kind: input, shape index: {}]   ;;  %s178_s2 = inlined_call_operand.hbm [shape: f32[8,128], index: 2, kind: output, shape index: {}]  }
   0x1   :  { %8 = vsyncpa [#allocation6], 0 }
   0x2   :  { %9 = vsyncpa [#allocation4], 0  ;;  %s147_s9 = smov [#allocation2]  }
   0x3   :  { %s15_s10 = sshll.u32 %s147_s9, 4  ;;  %s16_s10 = int_to_ptr.vmem [resolvable:$true] %s15_s10 }
   0x4   :  { %s89_s11 = scalar_lea.vmem %s16_s10, 256  ;;  %p94_p1 = scmp.lt.s32.totalorder %s16_s10, %s16_s10 }
   0x5   :  { %p90_p0 = scmp.ne.s32.totalorder %s16_s10, %s89_s11  ;;  %p95_p2 = scmp.lt.s32.totalorder %s89_s11, %s89_s11 }
   0x7   :  { %p96_p3 = por %p95_p2, %p94_p1 }
   0x9   :  { %p97_p4 = pnand %p96_p3, %p90_p0 }
   0xb   :  { %100 = shalt.err (!%p97_p4)
}
   0xc   :  { %s148_s12 = smov 128   ;;  %s149_s13 = smov 8  }
   0xd   :  { %21 = dma.hbm_to_vmem [thread:$0]  %s176_s0, 256, %s16_s10, [#allocation3], %s148_s12, %s148_s12, %s149_s13  }
   0xe   :  { %s150_s16 = smov [#allocation5]  }
   0xf   :  { %s27_s17 = sshll.u32 %s150_s16, 4  ;;  %s28_s17 = int_to_ptr.vmem [resolvable:$true] %s27_s17 }
  0x10   :  { %s109_s18 = scalar_lea.vmem %s28_s17, 256  ;;  %p114_p6 = scmp.lt.s32.totalorder %s28_s17, %s28_s17 }
  0x11   :  { %p110_p5 = scmp.ne.s32.totalorder %s28_s17, %s109_s18  ;;  %p115_p7 = scmp.lt.s32.totalorder %s109_s18, %s109_s18 }
  0x13   :  { %p116_p8 = por %p115_p7, %p114_p6 }
  0x15   :  { %p117_p9 = pnand %p116_p8, %p110_p5 }
  0x17   :  { %120 = shalt.err (!%p117_p9)
}
  0x18   :  { %33 = dma.hbm_to_vmem [thread:$0]  %s177_s1, 256, %s28_s17, [#allocation6], %s148_s12, %s148_s12, %s149_s13  }
  0x19   :  { %141 = dma.done.wait [#allocation3], 256  }
  0x1a   :  { %142 = vsyncadd [#allocation3], 4294967040 }
  0x1b   :  { %143 = dma.done.wait [#allocation6], 256  }
  0x1c   :  { %144 = vsyncadd [#allocation6], 4294967040  ;;  %v40_v0 = vld [vmem:[#allocation2] sm:$0xff]  ;;  %v41_v1 = vld [vmem:[#allocation2 + $0x8] sm:$0xff]  ;;  %s151_s0 = smov [#allocation7]  }
  0x1d   :  { %v46_v2 = vadd.f32 0.01, %v40_v0  ;;  %v47_v3 = vadd.f32 0.01, %v41_v1  ;;  %v42_v4 = vld [vmem:[#allocation5] sm:$0xff]  ;;  %v43_v5 = vld [vmem:[#allocation5 + $0x8] sm:$0xff] }
  0x1e   :  { %v44_v6 = vsub.f32 %v40_v0, %v42_v4  ;;  %v45_v7 = vsub.f32 %v41_v1, %v43_v5  ;;  %s62_s1 = sshll.u32 %s151_s0, 4  ;;  %s63_s1 = int_to_ptr.vmem [resolvable:$true] %s62_s1 }
  0x1f   :  { %77 = vrcp.f32 %v46_v2  ;;  %s121_s21 = scalar_lea.vmem %s63_s1, 128  ;;  %p126_p11 = scmp.lt.s32.totalorder %s63_s1, %s63_s1 }
  0x20   :  { %79 = vrcp.f32 %v47_v3  ;;  %p122_p10 = scmp.ne.s32.totalorder %s63_s1, %s121_s21  ;;  %p127_p12 = scmp.lt.s32.totalorder %s121_s21, %s121_s21 }
  0x22   :  { %p128_p13 = por %p127_p12, %p126_p11 }
  0x24   :  { %p129_p0 = pnand %p128_p13, %p122_p10 }
  0x2c   :  { %v78_v8 = vpop.eup %77 }
  0x2d   :  { %v80_v9 = vpop.eup %79  ;;  %v49_v10 = vmul.f32 %v78_v8, %v44_v6 }
  0x2e   :  { %v51_v11 = vmul.f32 %v80_v9, %v45_v7 }
  0x2f   :  { %v52_v12 = vmul.f32 %v49_v10, %v49_v10 }
  0x30   :  { %v53_v13 = vmul.f32 %v51_v11, %v51_v11 }
  0x32   :  { %v54_v14 = vadd.f32 %v53_v13, %v52_v12 }
  0x34   :  { %55 = vst [vmem:[#allocation7] sm:$0xff] %v54_v14 }
  0x35   :  { %132 = shalt.err (!%p129_p0)
}
  0x36   :  { %65 = dma.vmem_to_hbm [thread:$0]  %s63_s1, 128, %s178_s2, [#allocation4]  }
  0x37   :  { %145 = dma.done.wait [#allocation4], 128  }
  0x38   :  { %146 = vsyncadd [#allocation4], 4294967168 }
  0x39   :  { %69 = vsyncpa [#allocation3], 1 }
  0x3a   :  { %70 = vsyncpa [#allocation6], 1 }
  0x3b   :  { %71 = vsyncpa [#allocation4], 1 }

</bundles_post_ra>
